<compile_context>
chip_gen: v7x
topology: tpu7x:2x2x1
jax: 0.10.0
libtpu: 0.0.40
codegen_flags: <defaults>
</compile_context>

<pallas_src>
import functools
import numpy as np
import jax
import jax.numpy as jnp
from jax.experimental import pallas as pl
from jax.experimental.pallas import tpu as pltpu


def _round_up(x, m):
    return ((x + m - 1) // m) * m


def _stft_istft_tile_kernel(x_ref, fwd_ref, inv_ref, out_ref, fr_ref, *,
                            tile_m, n_reps, hop, n_fft, n_frames, n_tiles):
    """Process one tile of `tile_m` STFT frames.

    x_ref  : (1, tile_m + n_reps - 1, hop)  f32   hop-sized signal chunks (+halo)
    fwd_ref: (n_fft, kp)                    bf16  [w*cos | -w*sin] forward rDFT basis
    inv_ref: (kp, n_fft)                    bf16  inverse rDFT basis * synthesis window
    out_ref: (1, tile_m + n_reps - 1, hop)  f32   overlap-added chunk canvas (+halo)
    fr_ref : (tile_m, n_fft)                f32   scratch (frames, then time frames)
    """
    # 1) In-kernel framing: frame m = chunks[m : m + n_reps] laid out
    #    lane-contiguously (hop | n_fft), built with simple offset loads/stores.
    for c in range(n_reps):
        fr_ref[:, c * hop:(c + 1) * hop] = x_ref[0, c:c + tile_m, :]
    frames = fr_ref[...]

    # Mask frame rows that only exist because of tile padding: they share real
    # chunk data with valid frames, so they must be zeroed explicitly so they
    # contribute nothing to the overlap-add.
    if n_frames != n_tiles * tile_m:
        first_frame = (pl.program_id(0) % n_tiles) * tile_m
        row = jax.lax.broadcasted_iota(jnp.int32, (tile_m, 1), 0) + first_frame
        frames = jnp.where(row < n_frames, frames, 0.0)

    # 2) Forward rDFT (analysis window folded into the basis).  spec = [re | im],
    #    each half padded to a 128-lane boundary -> one lane-dense 256-wide matmul.
    spec = jnp.dot(frames.astype(fwd_ref.dtype), fwd_ref[...],
                   preferred_element_type=jnp.float32)

    # torch's polar round trip (abs -> angle -> mag * exp(1j*phase)) is an exact
    # algebraic identity on (re, im) (including mag == 0), so it is elided here.

    # 3) Inverse rDFT + synthesis window (both folded into inv basis) -> windowed
    #    time-domain frames, written back into the scratch.
    fr_ref[...] = jnp.dot(spec.astype(inv_ref.dtype), inv_ref[...],
                          preferred_element_type=jnp.float32)

    # 4) In-kernel overlap-add of this tile's frames into the halo'd chunk canvas.
    out_ref[...] = jnp.zeros_like(out_ref)
    for c in range(n_reps):
        out_ref[0, c:c + tile_m, :] += fr_ref[:, c * hop:(c + 1) * hop]


def torch_stft_forward(x, *, filter_length=128, hop_length=32, win_length=128,
                       tile_m=1024, compute_dtype=jnp.bfloat16):
    """JAX/Pallas equivalent of TorchSTFT(...).forward(x).
    x: (B, T) float32.  Returns (B, 1, (n_frames - 1) * hop) float32."""
    B, T = x.shape
    n_fft = filter_length
    hop = hop_length
    assert n_fft % hop == 0, "in-kernel framing/OLA needs hop_length | filter_length"
    # TODO(synk): support hop_length that does not divide filter_length.
    n_reps = n_fft // hop
    pad = n_fft // 2
    assert T > pad, "reflect padding (center=True) requires T > filter_length // 2"
    n_freq = n_fft // 2 + 1

    # Periodic Hann window (torch.hann_window default), center-padded to n_fft.
    n = np.arange(win_length, dtype=np.float64)
    win = 0.5 * (1.0 - np.cos(2.0 * np.pi * n / win_length))
    lpad = (n_fft - win_length) // 2
    win = np.pad(win, (lpad, n_fft - win_length - lpad))

    # Combined lane-aligned rDFT bases with the windows folded in.
    t_idx = np.arange(n_fft)
    f_idx = np.arange(n_freq)
    ang = 2.0 * np.pi * np.outer(t_idx, f_idx) / n_fft          # (n_fft, n_freq)
    scale = np.full(n_freq, 2.0)
    scale[0] = 1.0
    if n_fft % 2 == 0:
        scale[-1] = 1.0
    kp_half = _round_up(n_freq, 128)
    kp = 2 * kp_half
    fwd = np.zeros((n_fft, kp), np.float64)
    fwd[:, :n_freq] = win[:, None] * np.cos(ang)                         # Re
    fwd[:, kp_half:kp_half + n_freq] = -win[:, None] * np.sin(ang)       # Im
    inv = np.zeros((kp, n_fft), np.float64)
    inv[:n_freq, :] = (scale[:, None] * np.cos(ang).T / n_fft) * win[None, :]
    inv[kp_half:kp_half + n_freq, :] = (-scale[:, None] * np.sin(ang).T / n_fft) * win[None, :]
    fwd_b = jnp.asarray(fwd, dtype=compute_dtype)
    inv_b = jnp.asarray(inv, dtype=compute_dtype)

    # Framing geometry.
    n_frames = 1 + T // hop
    tm = _round_up(min(tile_m, _round_up(n_frames, 8)), 8)
    n_tiles = int(pl.cdiv(n_frames, tm))
    n_frames_pad = n_tiles * tm
    halo = n_reps - 1
    n_chunks = n_frames_pad + halo
    n_grid = B * n_tiles

    # center=True reflect padding, then reshape into hop-sized chunks.
    x_pad = jnp.pad(x.astype(jnp.float32), ((0, 0), (pad, pad)), mode="reflect")
    t_pad = x_pad.shape[1]
    need = n_chunks * hop
    if need >= t_pad:
        x_ext = jnp.pad(x_pad, ((0, 0), (0, need - t_pad)))
    else:
        x_ext = x_pad[:, :need]
    chunks = x_ext.reshape(B, n_chunks, hop)

    # Per-tile halo gather: ~(tm+halo)/tm ~= 1.01x data (vs 4x frame expansion in v1).
    chunk_idx = tm * jnp.arange(n_tiles)[:, None] + jnp.arange(tm + halo)[None, :]
    x_halo = chunks[:, chunk_idx, :].reshape(n_grid, tm + halo, hop)

    kernel = functools.partial(
        _stft_istft_tile_kernel, tile_m=tm, n_reps=n_reps, hop=hop,
        n_fft=n_fft, n_frames=n_frames, n_tiles=n_tiles)

    out_halo = pl.pallas_call(
        kernel,
        out_shape=jax.ShapeDtypeStruct((n_grid, tm + halo, hop), jnp.float32),
        grid=(n_grid,),
        in_specs=[
            pl.BlockSpec((1, tm + halo, hop), lambda g: (g, 0, 0)),
            pl.BlockSpec((n_fft, kp), lambda g: (0, 0)),   # resident across steps
            pl.BlockSpec((kp, n_fft), lambda g: (0, 0)),   # resident across steps
        ],
        out_specs=pl.BlockSpec((1, tm + halo, hop), lambda g: (g, 0, 0)),
        scratch_shapes=[pltpu.VMEM((tm, n_fft), jnp.float32)],
        compiler_params=pltpu.CompilerParams(
            dimension_semantics=("parallel",),
            vmem_limit_bytes=32 * 1024 * 1024),
    )(x_halo, fwd_b, inv_b)

    # Merge tile halos (scatter-add over ~1.01x data), then normalize + trim.
    acc = jnp.zeros((B, n_chunks, hop), jnp.float32)
    acc = acc.at[:, chunk_idx, :].add(out_halo.reshape(B, n_tiles, tm + halo, hop))
    y_full = acc.reshape(B, n_chunks * hop)

    # Window-envelope normalization (torch.istft); constant computed host-side.
    L = n_fft + hop * (n_frames - 1)
    idx_np = hop * np.arange(n_frames)[:, None] + np.arange(n_fft)[None, :]
    wsq = np.zeros(L, np.float64)
    np.add.at(wsq, idx_np.reshape(-1), np.tile(win * win, n_frames))
    env = jnp.asarray(np.where(wsq > 1e-11, wsq, 1.0), dtype=jnp.float32)
    y = y_full[:, :L] / env[None, :]

    # Trim the center padding: output length = (n_frames - 1) * hop.
    t_out = (n_frames - 1) * hop
    y = y[:, pad:pad + t_out]

    # torch: inverse_transform.unsqueeze(-2)
    return y[:, None, :]


if __name__ == "__main__":
    key = jax.random.PRNGKey(0)
    B, T = 2, 256
    filter_length, hop_length, win_length = 128, 32, 128  # small STFT config

    x = jax.random.normal(key, (B, T), dtype=jnp.float32)
    y = torch_stft_forward(x, filter_length=filter_length,
                           hop_length=hop_length, win_length=win_length)
    y = jax.block_until_ready(y)

    assert y.shape == (B, 1, T), y.shape
    assert y.dtype == jnp.float32
    # STFT -> mag/phase -> ISTFT is (near) perfect reconstruction; bf16 MXU
    # operands keep the error well below this loose threshold.
    err = float(jnp.mean(jnp.abs(y[:, 0, :] - x)))
    assert np.isfinite(err) and err < 0.1, err

    print("KERNEL_OK")
</pallas_src>

<mosaic_0001>
module attributes {stable_mosaic.version = 11 : i64} {
  func.func @_stft_istft_tile_kernel(%arg0: i32, %arg1: memref<1x19x32xf32, #tpu.memory_space<vmem>>, %arg2: memref<128x256xbf16, #tpu.memory_space<vmem>>, %arg3: memref<256x128xbf16, #tpu.memory_space<vmem>>, %arg4: memref<1x19x32xf32, #tpu.memory_space<vmem>>, %arg5: memref<16x128xf32, #tpu.memory_space<vmem>>) attributes {dimension_semantics = [#tpu.dimension_semantics<parallel>], iteration_bounds = array<i64: 2>, scalar_prefetch = 0 : i64, scratch_operands = 1 : i64, tpu.core_type = #tpu.core_type<tc>, window_params = [{transform_indices = @transform_0, window_bounds = array<i64: 1, 19, 32>}, {pipeline_mode = #tpu.pipeline_mode<synchronous>, transform_indices = @transform_1, window_bounds = array<i64: 128, 256>}, {pipeline_mode = #tpu.pipeline_mode<synchronous>, transform_indices = @transform_2, window_bounds = array<i64: 256, 128>}, {transform_indices = @transform_3, window_bounds = array<i64: 1, 19, 32>}]} {
    %c0 = arith.constant 0 : index
    %c0_0 = arith.constant 0 : index
    %c0_1 = arith.constant 0 : index
    %0 = vector.load %arg1[%c0, %c0_0, %c0_1] : memref<1x19x32xf32, #tpu.memory_space<vmem>>, vector<1x16x32xf32>
    %1 = vector.shape_cast %0 : vector<1x16x32xf32> to vector<16x32xf32>
    %c0_2 = arith.constant 0 : index
    %c0_3 = arith.constant 0 : index
    %2 = vector.load %arg5[%c0_2, %c0_3] : memref<16x128xf32, #tpu.memory_space<vmem>>, vector<16x32xf32>
    tpu.vector_store %arg5[%c0_2, %c0_3], %1 {strides = array<i32>} : memref<16x128xf32, #tpu.memory_space<vmem>>, vector<16x32xf32>,
    %c0_4 = arith.constant 0 : index
    %c1 = arith.constant 1 : index
    %c0_5 = arith.constant 0 : index
    %3 = vector.load %arg1[%c0_4, %c1, %c0_5] : memref<1x19x32xf32, #tpu.memory_space<vmem>>, vector<1x16x32xf32>
    %4 = vector.shape_cast %3 : vector<1x16x32xf32> to vector<16x32xf32>
    %c0_6 = arith.constant 0 : index
    %c32 = arith.constant 32 : index
    %5 = vector.load %arg5[%c0_6, %c32] : memref<16x128xf32, #tpu.memory_space<vmem>>, vector<16x32xf32>
    tpu.vector_store %arg5[%c0_6, %c32], %4 {strides = array<i32>} : memref<16x128xf32, #tpu.memory_space<vmem>>, vector<16x32xf32>,
    %c0_7 = arith.constant 0 : index
    %c2 = arith.constant 2 : index
    %c0_8 = arith.constant 0 : index
    %6 = vector.load %arg1[%c0_7, %c2, %c0_8] : memref<1x19x32xf32, #tpu.memory_space<vmem>>, vector<1x16x32xf32>
    %7 = vector.shape_cast %6 : vector<1x16x32xf32> to vector<16x32xf32>
    %c0_9 = arith.constant 0 : index
    %c64 = arith.constant 64 : index
    %8 = vector.load %arg5[%c0_9, %c64] : memref<16x128xf32, #tpu.memory_space<vmem>>, vector<16x32xf32>
    tpu.vector_store %arg5[%c0_9, %c64], %7 {strides = array<i32>} : memref<16x128xf32, #tpu.memory_space<vmem>>, vector<16x32xf32>,
    %c0_10 = arith.constant 0 : index
    %c3 = arith.constant 3 : index
    %c0_11 = arith.constant 0 : index
    %9 = vector.load %arg1[%c0_10, %c3, %c0_11] : memref<1x19x32xf32, #tpu.memory_space<vmem>>, vector<1x16x32xf32>
    %10 = vector.shape_cast %9 : vector<1x16x32xf32> to vector<16x32xf32>
    %c0_12 = arith.constant 0 : index
    %c96 = arith.constant 96 : index
    %11 = vector.load %arg5[%c0_12, %c96] : memref<16x128xf32, #tpu.memory_space<vmem>>, vector<16x32xf32>
    tpu.vector_store %arg5[%c0_12, %c96], %10 {strides = array<i32>} : memref<16x128xf32, #tpu.memory_space<vmem>>, vector<16x32xf32>,
    %c0_13 = arith.constant 0 : index
    %c0_14 = arith.constant 0 : index
    %12 = vector.load %arg5[%c0_13, %c0_14] : memref<16x128xf32, #tpu.memory_space<vmem>>, vector<16x128xf32>
    %c1_i32 = arith.constant 1 : i32
    %c0_i32 = arith.constant 0 : i32
    %13 = arith.cmpi eq, %c1_i32, %c0_i32 : i32
    %c1_i32_15 = arith.constant 1 : i32
    %14 = arith.select %13, %c1_i32_15, %c1_i32 : i32
    %15 = arith.remsi %arg0, %14 : i32
    %c0_i32_16 = arith.constant 0 : i32
    %16 = arith.cmpi ne, %15, %c0_i32_16 : i32
    %c0_i32_17 = arith.constant 0 : i32
    %17 = arith.cmpi slt, %15, %c0_i32_17 : i32
    %c0_i32_18 = arith.constant 0 : i32
    %18 = arith.cmpi slt, %14, %c0_i32_18 : i32
    %19 = arith.xori %17, %18 : i1
    %20 = arith.andi %19, %16 : i1
    %21 = arith.addi %15, %14 : i32
    %22 = arith.select %20, %21, %15 : i32
    %c16_i32 = arith.constant 16 : i32
    %23 = arith.muli %22, %c16_i32 : i32
    %24 = tpu.iota {dimensions = array<i32: 0>} : vector<16x1xi32>
    %25 = vector.broadcast %23 : i32 to vector<16x1xi32>
    %26 = arith.addi %24, %25 : vector<16x1xi32>
    %c9_i32 = arith.constant 9 : i32
    %27 = vector.broadcast %c9_i32 : i32 to vector<16x1xi32>
    %28 = arith.cmpi slt, %26, %27 : vector<16x1xi32>
    %cst = arith.constant 0.000000e+00 : f32
    %29 = vector.shape_cast %28 : vector<16x1xi1> to vector<16x1xi1>
    %30 = vector.broadcast %29 : vector<16x1xi1> to vector<16x128xi1>
    %31 = vector.broadcast %cst : f32 to vector<16x128xf32>
    %32 = arith.select %30, %12, %31 : vector<16x128xi1>, vector<16x128xf32>
    %33 = arith.truncf %32 : vector<16x128xf32> to vector<16x128xbf16>
    %c0_19 = arith.constant 0 : index
    %c0_20 = arith.constant 0 : index
    %34 = vector.load %arg2[%c0_19, %c0_20] : memref<128x256xbf16, #tpu.memory_space<vmem>>, vector<128x256xbf16>
    %cst_21 = arith.constant dense<0.000000e+00> : vector<16x256xf32>
    %35 = tpu.matmul %33, %34, %cst_21 {dimension_numbers = #tpu.dot_dimension_numbers<[1], [0], [0], [1], [0, 0, 1, 1], [], []>} : vector<16x128xbf16>, vector<128x256xbf16>, vector<16x256xf32> -> vector<16x256xf32>
    %36 = arith.truncf %35 : vector<16x256xf32> to vector<16x256xbf16>
    %c0_22 = arith.constant 0 : index
    %c0_23 = arith.constant 0 : index
    %37 = vector.load %arg3[%c0_22, %c0_23] : memref<256x128xbf16, #tpu.memory_space<vmem>>, vector<256x128xbf16>
    %cst_24 = arith.constant dense<0.000000e+00> : vector<16x128xf32>
    %38 = tpu.matmul %36, %37, %cst_24 {dimension_numbers = #tpu.dot_dimension_numbers<[1], [0], [0], [1], [0, 0, 1, 1], [], []>} : vector<16x256xbf16>, vector<256x128xbf16>, vector<16x128xf32> -> vector<16x128xf32>
    %c0_25 = arith.constant 0 : index
    %c0_26 = arith.constant 0 : index
    %39 = vector.load %arg5[%c0_25, %c0_26] : memref<16x128xf32, #tpu.memory_space<vmem>>, vector<16x128xf32>
    tpu.vector_store %arg5[%c0_25, %c0_26], %38 {strides = array<i32>} : memref<16x128xf32, #tpu.memory_space<vmem>>, vector<16x128xf32>,
    %cst_27 = arith.constant 0.000000e+00 : f32
    %40 = vector.broadcast %cst_27 : f32 to vector<1x19x32xf32>
    %c0_28 = arith.constant 0 : index
    %c0_29 = arith.constant 0 : index
    %c0_30 = arith.constant 0 : index
    %41 = vector.load %arg4[%c0_28, %c0_29, %c0_30] : memref<1x19x32xf32, #tpu.memory_space<vmem>>, vector<1x19x32xf32>
    tpu.vector_store %arg4[%c0_28, %c0_29, %c0_30], %40 {strides = array<i32>} : memref<1x19x32xf32, #tpu.memory_space<vmem>>, vector<1x19x32xf32>,
    %c0_31 = arith.constant 0 : index
    %c0_32 = arith.constant 0 : index
    %c0_33 = arith.constant 0 : index
    %42 = vector.load %arg4[%c0_31, %c0_32, %c0_33] : memref<1x19x32xf32, #tpu.memory_space<vmem>>, vector<1x16x32xf32>
    %43 = vector.shape_cast %42 : vector<1x16x32xf32> to vector<16x32xf32>
    %c0_34 = arith.constant 0 : index
    %c0_35 = arith.constant 0 : index
    %44 = vector.load %arg5[%c0_34, %c0_35] : memref<16x128xf32, #tpu.memory_space<vmem>>, vector<16x32xf32>
    %45 = arith.addf %43, %44 : vector<16x32xf32>
    %c0_36 = arith.constant 0 : index
    %c0_37 = arith.constant 0 : index
    %c0_38 = arith.constant 0 : index
    %46 = vector.load %arg4[%c0_36, %c0_37, %c0_38] : memref<1x19x32xf32, #tpu.memory_space<vmem>>, vector<1x16x32xf32>
    %47 = vector.shape_cast %46 : vector<1x16x32xf32> to vector<16x32xf32>
    %48 = vector.shape_cast %45 : vector<16x32xf32> to vector<1x16x32xf32>
    tpu.vector_store %arg4[%c0_36, %c0_37, %c0_38], %48 {strides = array<i32>} : memref<1x19x32xf32, #tpu.memory_space<vmem>>, vector<1x16x32xf32>,
    %c0_39 = arith.constant 0 : index
    %c1_40 = arith.constant 1 : index
    %c0_41 = arith.constant 0 : index
    %49 = vector.load %arg4[%c0_39, %c1_40, %c0_41] : memref<1x19x32xf32, #tpu.memory_space<vmem>>, vector<1x16x32xf32>
    %50 = vector.shape_cast %49 : vector<1x16x32xf32> to vector<16x32xf32>
    %c0_42 = arith.constant 0 : index
    %c32_43 = arith.constant 32 : index
    %51 = vector.load %arg5[%c0_42, %c32_43] : memref<16x128xf32, #tpu.memory_space<vmem>>, vector<16x32xf32>
    %52 = arith.addf %50, %51 : vector<16x32xf32>
    %c0_44 = arith.constant 0 : index
    %c1_45 = arith.constant 1 : index
    %c0_46 = arith.constant 0 : index
    %53 = vector.load %arg4[%c0_44, %c1_45, %c0_46] : memref<1x19x32xf32, #tpu.memory_space<vmem>>, vector<1x16x32xf32>
    %54 = vector.shape_cast %53 : vector<1x16x32xf32> to vector<16x32xf32>
    %55 = vector.shape_cast %52 : vector<16x32xf32> to vector<1x16x32xf32>
    tpu.vector_store %arg4[%c0_44, %c1_45, %c0_46], %55 {strides = array<i32>} : memref<1x19x32xf32, #tpu.memory_space<vmem>>, vector<1x16x32xf32>,
    %c0_47 = arith.constant 0 : index
    %c2_48 = arith.constant 2 : index
    %c0_49 = arith.constant 0 : index
    %56 = vector.load %arg4[%c0_47, %c2_48, %c0_49] : memref<1x19x32xf32, #tpu.memory_space<vmem>>, vector<1x16x32xf32>
    %57 = vector.shape_cast %56 : vector<1x16x32xf32> to vector<16x32xf32>
    %c0_50 = arith.constant 0 : index
    %c64_51 = arith.constant 64 : index
    %58 = vector.load %arg5[%c0_50, %c64_51] : memref<16x128xf32, #tpu.memory_space<vmem>>, vector<16x32xf32>
    %59 = arith.addf %57, %58 : vector<16x32xf32>
    %c0_52 = arith.constant 0 : index
    %c2_53 = arith.constant 2 : index
    %c0_54 = arith.constant 0 : index
    %60 = vector.load %arg4[%c0_52, %c2_53, %c0_54] : memref<1x19x32xf32, #tpu.memory_space<vmem>>, vector<1x16x32xf32>
    %61 = vector.shape_cast %60 : vector<1x16x32xf32> to vector<16x32xf32>
    %62 = vector.shape_cast %59 : vector<16x32xf32> to vector<1x16x32xf32>
    tpu.vector_store %arg4[%c0_52, %c2_53, %c0_54], %62 {strides = array<i32>} : memref<1x19x32xf32, #tpu.memory_space<vmem>>, vector<1x16x32xf32>,
    %c0_55 = arith.constant 0 : index
    %c3_56 = arith.constant 3 : index
    %c0_57 = arith.constant 0 : index
    %63 = vector.load %arg4[%c0_55, %c3_56, %c0_57] : memref<1x19x32xf32, #tpu.memory_space<vmem>>, vector<1x16x32xf32>
    %64 = vector.shape_cast %63 : vector<1x16x32xf32> to vector<16x32xf32>
    %c0_58 = arith.constant 0 : index
    %c96_59 = arith.constant 96 : index
    %65 = vector.load %arg5[%c0_58, %c96_59] : memref<16x128xf32, #tpu.memory_space<vmem>>, vector<16x32xf32>
    %66 = arith.addf %64, %65 : vector<16x32xf32>
    %c0_60 = arith.constant 0 : index
    %c3_61 = arith.constant 3 : index
    %c0_62 = arith.constant 0 : index
    %67 = vector.load %arg4[%c0_60, %c3_61, %c0_62] : memref<1x19x32xf32, #tpu.memory_space<vmem>>, vector<1x16x32xf32>
    %68 = vector.shape_cast %67 : vector<1x16x32xf32> to vector<16x32xf32>
    %69 = vector.shape_cast %66 : vector<16x32xf32> to vector<1x16x32xf32>
    tpu.vector_store %arg4[%c0_60, %c3_61, %c0_62], %69 {strides = array<i32>} : memref<1x19x32xf32, #tpu.memory_space<vmem>>, vector<1x16x32xf32>,
    return
  }
  func.func @transform_0(%arg0: i32) -> (i32, i32, i32) {
    %c0_i32 = arith.constant 0 : i32
    %c0_i32_0 = arith.constant 0 : i32
    %c0_i32_1 = arith.constant 0 : i32
    return %arg0, %c0_i32, %c0_i32_0 : i32, i32, i32
  }
  func.func @transform_1(%arg0: i32) -> (i32, i32) {
    %c0_i32 = arith.constant 0 : i32
    %c0_i32_0 = arith.constant 0 : i32
    %c0_i32_1 = arith.constant 0 : i32
    return %c0_i32, %c0_i32_0 : i32, i32
  }
  func.func @transform_2(%arg0: i32) -> (i32, i32) {
    %c0_i32 = arith.constant 0 : i32
    %c0_i32_0 = arith.constant 0 : i32
    %c0_i32_1 = arith.constant 0 : i32
    return %c0_i32, %c0_i32_0 : i32, i32
  }
  func.func @transform_3(%arg0: i32) -> (i32, i32, i32) {
    %c0_i32 = arith.constant 0 : i32
    %c0_i32_0 = arith.constant 0 : i32
    %c0_i32_1 = arith.constant 0 : i32
    return %arg0, %c0_i32, %c0_i32_0 : i32, i32, i32
  }
}

</mosaic_0001>

<bundles_post_ra>
// kernel: tpu_custom_call.1
= control target key start
LH: loop header
LB: loop body
LE: loop exit
PB: predicated region body
PF: predicated region fallthrough
CT: control target
= control target key end

     0   :  { %8 = vsyncpa [#allocation4], 0  ;;  %s1108_s0 = inlined_call_operand.vmem [shape: f32[2,19,32], index: 0, kind: input, shape index: {}]   ;;  %s1109_s1 = inlined_call_operand.hbm [shape: bf16[128,256], index: 1, kind: input, shape index: {}]   ;;  %s1110_s2 = inlined_call_operand.hbm [shape: bf16[256,128], index: 2, kind: input, shape index: {}]   ;;  %s1111_s3 = inlined_call_operand.vmem [shape: f32[2,19,32], index: 3, kind: output, shape index: {}]  }
   0x1   :  { %9 = vsyncpa [#allocation6], 0  ;;  %s963_s12 = smov 0  }
   0x2 LB: > { %s931_s13 = smov [#allocation3]   ;;  %s969_s15 = sadd.s32 4294967295, %s929_s12   ;;  %s929_s12 = sphi %s963_s12, %s15_s12  }
   0x3   : > { %s126_s14 = sshll.u32 %s931_s13, 4  ;;  %p711_p0 = scmp.ge.s32.totalorder %s929_s12, 1  ;;  %s127_s14 = int_to_ptr.vmem [resolvable:$true] %s126_s14 }
   0x4   : > { %p114_p1 = scmp.lt.s32.totalorder %s929_s12, 3  ;;  %p1112_p3 = scmp.eq.s32.totalorder %s969_s15, 0 }
   0x5   : > { %s932_s17 = smov [#allocation5]   ;;  %s859_s22 = scalar_lea.hbm %s1109_s1, 2048 }
   0x6   : > { %p973_p2 = pnand %p711_p0, %p114_p1  ;;  %s139_s18 = sshll.u32 %s932_s17, 4  ;;  %s986_s18 = int_to_ptr.vmem [resolvable:$true] %s139_s18 }
   0x7   : > { %p860_p6 = scmp.ne.s32.totalorder %s1109_s1, %s859_s22  ;;  %p866_p10 = scmp.lt.u32.totalorder %s859_s22, %s1109_s1 }
   0x8   : > { %s1114_s16 = scalar_select %p973_p2, 1, 0 }
   0x9   : > { %p788_p4 = pneg %p973_p2 }
   0xb   : > { %p982_p5 = pnand %p1112_p3, %p788_p4 }
   0xd   : > { %p861_p7 = pneg %p982_p5 }
   0xf   : > { %p862_p8 = pnand %p861_p7, %p860_p6 }
  0x11   : > { %p863_p9 = pneg %p862_p8 }
  0x13   : > { %p868_p11 = pnand %p866_p10, %p863_p9 }
  0x15   : > { %871 = shalt.err (!%p868_p11)
}
  0x16   : > { %s872_s27 = scalar_lea.vmem %s127_s14, 2048  ;;  %p880_p1 = scmp.lt.s32.totalorder %s127_s14, %s127_s14 }
  0x17   : > { %p873_p12 = scmp.ne.s32.totalorder %s127_s14, %s872_s27  ;;  %p881_p4 = scmp.lt.s32.totalorder %s872_s27, %s872_s27 }
  0x19   : > { %p875_p13 = pnand %p873_p12, %p861_p7  ;;  %p882_p3 = por %p881_p4, %p880_p1 }
  0x1b   : > { %p876_p0 = pneg %p875_p13 }
  0x1d   : > { %p883_p2 = pnand %p882_p3, %p876_p0 }
  0x1f   : > { %886 = shalt.err (!%p883_p2)
}
  0x20   : > { %s933_s28 = smov 128   ;;  %s934_s29 = smov 8  }
  0x21   : > { %791 = dma.hbm_to_vmem [thread:$0]  (!%p982_p5), %s1109_s1, 2048, %s127_s14, [#allocation4], %s933_s28, %s933_s28, %s934_s29  }
  0x22   : > { %s887_s7 = scalar_lea.hbm %s1110_s2, 2048 }
  0x23   : > { %p888_p6 = scmp.ne.s32.totalorder %s1110_s2, %s887_s7  ;;  %p894_p8 = scmp.lt.u32.totalorder %s887_s7, %s1110_s2 }
  0x25   : > { %p890_p2 = pnand %p888_p6, %p861_p7 }
  0x27   : > { %p891_p3 = pneg %p890_p2 }
  0x29   : > { %p896_p9 = pnand %p894_p8, %p891_p3 }
  0x2b   : > { %899 = shalt.err (!%p896_p9)
}
  0x2c   : > { %s900_s13 = scalar_lea.vmem %s986_s18, 2048  ;;  %p908_p13 = scmp.lt.s32.totalorder %s986_s18, %s986_s18 }
  0x2d   : > { %p901_p10 = scmp.ne.s32.totalorder %s986_s18, %s900_s13  ;;  %p909_p0 = scmp.lt.s32.totalorder %s900_s13, %s900_s13 }
  0x2f   : > { %p903_p11 = pnand %p901_p10, %p861_p7  ;;  %p910_p1 = por %p909_p0, %p908_p13 }
  0x31   : > { %p904_p12 = pneg %p903_p11 }
  0x33   : > { %p911_p4 = pnand %p910_p1, %p904_p12 }
  0x35   : > { %914 = shalt.err (!%p911_p4)
}
  0x36   : > { %s935_s14 = smov 64   ;;  %s936_s17 = smov 4  }
  0x37   : > { %794 = dma.hbm_to_vmem [thread:$0]  (!%p982_p5), %s1110_s2, 2048, %s986_s18, [#allocation6], %s935_s14, %s935_s14, %s936_s17  }
  0x38   : > { %p1116_p6 = scmp.ne.s32.totalorder %s1114_s16, 0 }
  0x39   : > { %p1117_p7 = scmp.eq.s32.totalorder (!%p1116_p6), %s969_s15, 0 }
  0x3a   : > { %163 = sbr.rel (%p1116_p6) target bundleno = 784 (0x310), region = 32 }
  0x41   : > { %920 = dma.done.wait (%p1117_p7), [#allocation4], 2048   ;;  %p1118_p2 = pmov %p1117_p7 }
  0x43   : > { %922 = vsyncadd (%p1118_p2), [#allocation4], 4294965248  ;;  %p1119_p3 = pmov %p1118_p2 }
  0x44   : > { %p1120_p8 = pmov %p1118_p2 }
  0x45   : > { %924 = dma.done.wait (%p1119_p3), [#allocation6], 2048  }
  0x46   : > { %926 = vsyncadd (%p1120_p8), [#allocation6], 4294965248  ;;  %p191_p9 = scmp.lt.s32.totalorder %s969_s15, 1  ;;  %v937_v0 = vmov 0   ;;  %s938_s23 = smov 64   ;;  %vm204_vm0 = vcmask 261120   ;;  %v248_v40 = vlaneseq }
  0x47   : > { %388 = vmatprep.mubr.bf16.mxu0 %v937_v0  ;;  %s939_s24 = smov 32   ;;  %v819_v5 = vld [vmem:[#allocation3 + $0x4] ss:$8 sps:$4 sm:$0xff]   ;;  %v821_v6 = vld [vmem:[#allocation3] ss:$8 sps:$4 sm:$0xff]   ;;  %s940_s25 = smov 96  }
  0x48   : > { %s1122_s15 = smov (!%p191_p9, %s969_s15), 1  ;;  %356 = vmatprep.subr.bf16.mxu0 %v819_v5  ;;  %v822_v7 = vld [vmem:[#allocation3 + $0x14] ss:$8 sps:$4 sm:$0xff]   ;;  %v824_v10 = vld [vmem:[#allocation3 + $0x10] ss:$8 sps:$4 sm:$0xff]   ;;  %v843_v18 = vld [vmem:[#allocation5 + $0x40] sm:$0xff]  }
  0x49   : > { %s779_s16 = smul.u32 24, %s1122_s15  ;;  %357 = vmatpush1.bf16.msra.mxu0 %v821_v6  ;;  %v825_v11 = vld [vmem:[#allocation3 + $0x24] ss:$8 sps:$4 sm:$0xff]   ;;  %v827_v14 = vld [vmem:[#allocation3 + $0x20] ss:$8 sps:$4 sm:$0xff]   ;;  %757 = vmatprep.subr.bf16.mxu1 %v843_v18  ;;  %v847_v23 = vld [vmem:[#allocation5 + $0x50] sm:$0xff]  }
  0x4a   : > { %358 = vmatprep.subr.bf16.mxu0 %v822_v7  ;;  %v828_v15 = vld [vmem:[#allocation3 + $0x34] ss:$8 sps:$4 sm:$0xff]   ;;  %v830_v16 = vld [vmem:[#allocation3 + $0x30] ss:$8 sps:$4 sm:$0xff]   ;;  %v831_v17 = vld [vmem:[#allocation3 + $0x44] ss:$8 sps:$4 sm:$0xff]  }
  0x4b   : > { %s195_s22 = scalar_lea.vmem %s1108_s0, %s779_s16  ;;  %v844_v19 = vld [vmem:[#allocation5] sm:$0xff]   ;;  %v845_v21 = vld [vmem:[#allocation5 + $0x48] sm:$0xff]   ;;  %v834_v24 = vld [vmem:[#allocation3 + $0x54] ss:$8 sps:$4 sm:$0xff]   ;;  %vm217_vm1 = vcmask 523520   ;;  %vm230_vm2 = vcmask 785920   ;;  %s1068_s28 = scalar_lea.vmem %s1111_s3, %s779_s16 }
  0x4c   : > { %v220_v1 = vld [vmem:[%s195_s22 + $0x2] sm:$0xff]  ;;  %v221_v3 = vld [vmem:[%s195_s22 + $0xa] sm:$0xff]  ;;  %758 = vmatpush3.bf16.msra.mxu1 %v844_v19  ;;  %v846_v22 = vld [vmem:[#allocation5 + $0x8] sm:$0xff]   ;;  %v249_v43 = vshrl.u32 %v248_v40, 7  ;;  %vm243_vm3 = vcmask 1048320   ;;  %vm941_vm5 = vmmov 1  }
  0x4d   : > { %v207_v2 = vld [vmem:[%s195_s22 + $0x1] sm:$0xff]  ;;  %224 = vrot.lane.b32.xlu1 %v220_v1, %s938_s23  ;;  %v208_v4 = vld [vmem:[%s195_s22 + $0x9] sm:$0xff]  ;;  %359 = vmatpush1.bf16.msra.mxu0 %v824_v10  ;;  %v837_v28 = vld [vmem:[#allocation3 + $0x64] ss:$8 sps:$4 sm:$0xff]   ;;  %v942_v59 = vmov 0.0   ;;  %vm574_vm7 = vcmask 256000  }
  0x4e   : > { %211 = vrot.lane.b32.xlu0 %v207_v2, %s939_s24  ;;  %v234_v8 = vld [vmem:[%s195_s22 + $0xb] sm:$0xff]  ;;  %v233_v9 = vld [vmem:[%s195_s22 + $0x3] sm:$0xff]  ;;  %360 = vmatprep.subr.bf16.mxu0 %v825_v11  ;;  %v853_v35 = vld [vmem:[#allocation5 + $0x68] sm:$0xff]   ;;  %v250_v46 = vadd.s32 8, %v249_v43  ;;  %572 = vst.msk [vmem:[%s1068_s28] sm:$0xff] %vm204_vm0, %v942_v59 }
  0x4f   : > { %v202_v12 = vld [vmem:[%s195_s22] sm:$0xff]  ;;  %v203_v13 = vld [vmem:[%s195_s22 + $0x8] sm:$0xff]  ;;  %v833_v20 = vld [vmem:[#allocation3 + $0x40] ss:$8 sps:$4 sm:$0xff]   ;;  %759 = vmatprep.subr.bf16.mxu1 %v845_v21  ;;  %573 = vst.msk [vmem:[%s1068_s28 + $0x8] sm:$0xff] %vm204_vm0, %v942_v59 }
  0x50   : > { %205 = vst.msk [vmem:[#allocation2] sm:$0xff] %vm204_vm0, %v202_v12  ;;  %206 = vst.msk [vmem:[#allocation2 + $0x8] sm:$0xff] %vm204_vm0, %v203_v13  ;;  %v836_v25 = vld [vmem:[#allocation3 + $0x50] ss:$8 sps:$4 sm:$0xff]   ;;  %760 = vmatpush3.bf16.msra.mxu1 %v846_v22  ;;  %v839_v29 = vld [vmem:[#allocation3 + $0x60] ss:$8 sps:$4 sm:$0xff]  }
  0x51   : > { %226 = vrot.lane.b32.xlu1 %v221_v3, %s938_s23  ;;  %361 = vmatpush1.bf16.msra.mxu0 %v827_v14  ;;  %v848_v26 = vld [vmem:[#allocation5 + $0x10] sm:$0xff]   ;;  %v849_v27 = vld [vmem:[#allocation5 + $0x58] sm:$0xff]   ;;  %v851_v32 = vld [vmem:[#allocation5 + $0x60] sm:$0xff]   ;;  %vm252_vm4 = vcmp.lt.s32.totalorder %v250_v46, 9  ;;  %575 = vst.msk [vmem:[%s1068_s28 + $0x10] sm:$0x7] %vm574_vm7, %v942_v59 }
  0x52   : > { %213 = vrot.lane.b32.xlu0 %v208_v4, %s939_s24  ;;  %362 = vmatprep.subr.bf16.mxu0 %v828_v15  ;;  %v840_v30 = vld [vmem:[#allocation3 + $0x74] ss:$8 sps:$4 sm:$0xff]   ;;  %v852_v33 = vld [vmem:[#allocation5 + $0x20] sm:$0xff]   ;;  %v842_v34 = vld [vmem:[#allocation3 + $0x70] ss:$8 sps:$4 sm:$0xff]  }
  0x53   : > { %761 = vmatprep.subr.bf16.mxu1 %v847_v23  ;;  %v850_v31 = vld [vmem:[#allocation5 + $0x18] sm:$0xff]   ;;  %v854_v36 = vld [vmem:[#allocation5 + $0x28] sm:$0xff]   ;;  %v855_v37 = vld [vmem:[#allocation5 + $0x70] sm:$0xff]  }
  0x54   : > { %762 = vmatpush3.bf16.msra.mxu1 %v848_v26  ;;  %vm736_vm6 = vmpackc.low %vm252_vm4, %vm941_vm5  ;;  %v856_v50 = vld [vmem:[#allocation5 + $0x30] sm:$0xff]   ;;  %v857_v51 = vld [vmem:[#allocation5 + $0x78] sm:$0xff]  }
  0x55   : > { %239 = vrot.lane.b32.xlu1 %v234_v8, %s940_s25  ;;  %363 = vmatpush1.bf16.msra.mxu0 %v830_v16  ;;  %v858_v52 = vld [vmem:[#allocation5 + $0x38] sm:$0xff]   ;;  %v576_v62 = vld [vmem:[%s1068_s28] sm:$0xff] }
  0x56   : > { %237 = vrot.lane.b32.xlu0 %v233_v9, %s940_s25  ;;  %364 = vmatprep.subr.bf16.mxu0 %v831_v17  ;;  %v577_v2 = vld [vmem:[%s1068_s28 + $0x8] sm:$0xff] }
  0x57   : > { %763 = vmatprep.subr.bf16.mxu1 %v849_v27 }
  0x58   : > { %764 = vmatpush3.bf16.msra.mxu1 %v850_v31 }
  0x59   : > { %365 = vmatpush1.bf16.msra.mxu0 %v833_v20  ;;  %765 = vmatprep.subr.bf16.mxu1 %v851_v32 }
  0x5a   : > { %366 = vmatprep.subr.bf16.mxu0 %v834_v24 }
  0x5c   : > { %766 = vmatpush3.bf16.msra.mxu1 %v852_v33 }
  0x5d   : > { %367 = vmatpush1.bf16.msra.mxu0 %v836_v25  ;;  %767 = vmatprep.subr.bf16.mxu1 %v853_v35 }
  0x5e   : > { %368 = vmatprep.subr.bf16.mxu0 %v837_v28 }
  0x60   : > { %768 = vmatpush3.bf16.msra.mxu1 %v854_v36 }
  0x61   : > { %369 = vmatpush1.bf16.msra.mxu0 %v839_v29  ;;  %769 = vmatprep.subr.bf16.mxu1 %v855_v37 }
  0x62   : > { %370 = vmatprep.subr.bf16.mxu0 %v840_v30 }
  0x64   : > { %770 = vmatpush3.bf16.msra.mxu1 %v856_v50 }
  0x65   : > { %371 = vmatpush1.bf16.msra.mxu0 %v842_v34  ;;  %771 = vmatprep.subr.bf16.mxu1 %v857_v51 }
  0x68   : > { %772 = vmatpush3.bf16.msra.mxu1 %v858_v52 }
  0xbf   : > { %v225_v38 = vpop.permute.xlu1 %224 }
  0xc0   : > { %v212_v39 = vpop.permute.xlu0 %211 }
  0xc1   : > { %218 = vst.msk [vmem:[#allocation2] sm:$0xff] %vm217_vm1, %v212_v39 }
  0xc2   : > { %231 = vst.msk [vmem:[#allocation2] sm:$0xff] %vm230_vm2, %v225_v38 }
  0xc3   : > { %v227_v41 = vpop.permute.xlu1 %226 }
  0xc4   : > { %v214_v42 = vpop.permute.xlu0 %213 }
  0xc5   : > { %219 = vst.msk [vmem:[#allocation2 + $0x8] sm:$0xff] %vm217_vm1, %v214_v42 }
  0xc6   : > { %232 = vst.msk [vmem:[#allocation2 + $0x8] sm:$0xff] %vm230_vm2, %v227_v41 }
  0xc7   : > { %v240_v44 = vpop.permute.xlu1 %239 }
  0xc8   : > { %v238_v45 = vpop.permute.xlu0 %237  ;;  %245 = vst.msk [vmem:[#allocation2 + $0x8] sm:$0xff] %vm243_vm3, %v240_v44 }
  0xc9   : > { %244 = vst.msk [vmem:[#allocation2] sm:$0xff] %vm243_vm3, %v238_v45 }
  0xcf   : > { %v247_v48 = vld [vmem:[#allocation2 + $0x8] sm:$0xff] }
  0xd0   : > { %v246_v47 = vld [vmem:[#allocation2] sm:$0xff] }
  0xd1   : > { %v737_v49 = vpack.c.bf16 %v247_v48, %v246_v47 }
  0xd3   : > { %738 = vmatmul.mubr.msk.bf16.vlgmr.msra.gmra.mrb[0].mxu0 %vm736_vm6, %v737_v49 }
 0x1a6   : > { %v390_v53 = vpop.f32.mrb[0].mxu0 }
 0x1a7   : > { %v392_v54 = vpop.f32.mrb[1].mxu0 }
 0x1a8   : > { %v394_v55 = vpop.f32.mrb[2].mxu0 }
 0x1a9   : > { %v399_v56 = vpack.c.bf16 %v394_v55, %v390_v53  ;;  %v396_v57 = vpop.f32.mrb[3].mxu0 }
 0x1aa   : > { %v400_v58 = vpack.c.bf16 %v396_v57, %v392_v54 }
 0x1ac   : > { %561 = vmatprep.mubr.bf16.mxu1 %v400_v58 }
 0x1ad   : > { %562 = vmatmul.mubr.bf16.vlgmr.msra.gmra.mrb[0].mxu1 %v399_v56 }
 0x280   : > { %v773_v60 = vpop.f32.mrb[0].mxu1 }
 0x281   : > { %v774_v61 = vpop.f32.mrb[1].mxu1 }
 0x282   : > { %v775_v63 = vadd.f32 %v774_v61, %v773_v60  ;;  %v776_v0 = vpop.f32.mrb[2].mxu1 }
 0x283   : > { %v777_v1 = vpop.f32.mrb[3].mxu1 }
 0x284   : > { %570 = vst [vmem:[#allocation2] sm:$0xff] %v775_v63  ;;  %v778_v3 = vadd.f32 %v777_v1, %v776_v0  ;;  %590 = vrot.lane.b32.xlu0 %v775_v63, %s940_s25  ;;  %v580_v4 = vadd.f32 %v775_v63, %v576_v62 }
 0x286   : > { %571 = vst [vmem:[#allocation2 + $0x8] sm:$0xff] %v778_v3  ;;  %592 = vrot.lane.b32.xlu1 %v778_v3, %s940_s25  ;;  %v581_v5 = vadd.f32 %v778_v3, %v577_v2  ;;  %582 = vst.msk [vmem:[%s1068_s28] sm:$0xff] %vm204_vm0, %v580_v4 }
 0x288   : > { %606 = vrot.lane.b32.xlu0 %v775_v63, %s938_s23  ;;  %583 = vst.msk [vmem:[%s1068_s28 + $0x8] sm:$0xff] %vm204_vm0, %v581_v5 }
 0x28a   : > { %608 = vrot.lane.b32.xlu1 %v778_v3, %s938_s23 }
 0x28c   : > { %622 = vrot.lane.b32.xlu0 %v775_v63, %s939_s24 }
 0x28e   : > { %624 = vrot.lane.b32.xlu1 %v778_v3, %s939_s24 }
 0x28f   : > { %v584_v7 = vld [vmem:[%s1068_s28 + $0x1] sm:$0xff]  ;;  %v585_v10 = vld [vmem:[%s1068_s28 + $0x9] sm:$0xff] }
 0x2f6   : > { %v591_v6 = vpop.permute.xlu0 %590 }
 0x2f7   : > { %v596_v8 = vadd.f32 %v591_v6, %v584_v7 }
 0x2f8   : > { %v593_v9 = vpop.permute.xlu1 %592 }
 0x2f9   : > { %598 = vst.msk [vmem:[%s1068_s28 + $0x1] sm:$0xff] %vm204_vm0, %v596_v8  ;;  %v597_v11 = vadd.f32 %v593_v9, %v585_v10 }
 0x2fa   : > { %v607_v12 = vpop.permute.xlu0 %606 }
 0x2fb   : > { %599 = vst.msk [vmem:[%s1068_s28 + $0x9] sm:$0xff] %vm204_vm0, %v597_v11 }
 0x2fc   : > { %v609_v14 = vpop.permute.xlu1 %608 }
 0x2fe   : > { %v623_v18 = vpop.permute.xlu0 %622 }
 0x300   : > { %v625_v20 = vpop.permute.xlu1 %624 }
 0x302   : > { %v600_v13 = vld [vmem:[%s1068_s28 + $0x2] sm:$0xff]  ;;  %v601_v15 = vld [vmem:[%s1068_s28 + $0xa] sm:$0xff] }
 0x303   : > { %v612_v16 = vadd.f32 %v607_v12, %v600_v13  ;;  %v613_v17 = vadd.f32 %v609_v14, %v601_v15 }
 0x305   : > { %614 = vst.msk [vmem:[%s1068_s28 + $0x2] sm:$0xff] %vm204_vm0, %v612_v16  ;;  %615 = vst.msk [vmem:[%s1068_s28 + $0xa] sm:$0xff] %vm204_vm0, %v613_v17 }
 0x30c   : > { %v616_v19 = vld [vmem:[%s1068_s28 + $0x3] sm:$0xff]  ;;  %v617_v21 = vld [vmem:[%s1068_s28 + $0xb] sm:$0xff] }
 0x30d   : > { %v628_v22 = vadd.f32 %v623_v18, %v616_v19  ;;  %v629_v23 = vadd.f32 %v625_v20, %v617_v21 }
 0x30f   : > { %630 = vst.msk [vmem:[%s1068_s28 + $0x3] sm:$0xff] %vm204_vm0, %v628_v22  ;;  %631 = vst.msk [vmem:[%s1068_s28 + $0xb] sm:$0xff] %vm204_vm0, %v629_v23 }
 0x310 PF: > { %s15_s12 = sadd.s32 1, %s929_s12  }
 0x311   : > { %p12_p5 = scmp.ge.s32.totalorder %s15_s12, 4  }
 0x313   :  { %14 = sbr.rel (!%p12_p5) target bundleno = 2 (0x2), region = 71 }
 0x31a   :  { %653 = vsyncpa [#allocation4], 1 }
 0x31b   :  { %655 = vsyncpa [#allocation4 + $0x1], 1 }
 0x31c   :  { %656 = vsyncpa [#allocation6], 1 }

</bundles_post_ra>
